<compile_context>
chip_gen: v5e
topology: v5e:2x2
jax: 0.10.0
libtpu: 0.0.40
codegen_flags: <defaults>
</compile_context>

<pallas_src>
import math

import jax
import jax.numpy as jnp
from jax.experimental import pallas as pl
from jax.experimental.pallas import tpu as pltpu


def _round_up(x: int, m: int) -> int:
    return ((x + m - 1) // m) * m


# ----------------------------------------------------------------------------
# Kernels
# ----------------------------------------------------------------------------
def _linear_kernel_2d(x_ref, w_ref, b_ref, o_ref):
    # x_ref: (tm, Kp) bf16   w_ref: (Kp, tn) bf16   b_ref: (1, tn) f32   o_ref: (tm, tn)
    acc = jnp.dot(x_ref[...], w_ref[...], preferred_element_type=jnp.float32)
    o_ref[...] = (acc + b_ref[...].astype(jnp.float32)).astype(o_ref.dtype)


def _linear_kernel_3d(x_ref, w_ref, b_ref, o_ref, acc_ref):
    # Fallback for very large K: x_ref (tm, tk), w_ref (tk, tn), acc_ref (tm, tn) f32.
    @pl.when(pl.program_id(2) == 0)
    def _():
        acc_ref[...] = jnp.zeros_like(acc_ref)

    acc_ref[...] += jnp.dot(x_ref[...], w_ref[...], preferred_element_type=jnp.float32)

    @pl.when(pl.program_id(2) == pl.num_programs(2) - 1)
    def _():
        o_ref[...] = (acc_ref[...] + b_ref[...].astype(jnp.float32)).astype(o_ref.dtype)


# ----------------------------------------------------------------------------
# Wrapper
# ----------------------------------------------------------------------------
def make_linear_projector(
    weight: jax.Array,
    bias: jax.Array,
    *,
    tm: int = 1024,
    tn: int = 1024,
    tk: int | None = None,           # None -> full K (single K step, 2-D grid)
    compute_dtype=jnp.bfloat16,      # MXU-native input dtype; accumulation is f32
    out_dtype=None,                  # default: dtype of the activations
    vmem_limit_bytes: int = 48 * 1024 * 1024,
):
    """Prepare the projector weight ONCE and return an apply(x) closure.

    weight: [llm_dim, vision_dim]  (PyTorch nn.Linear layout)
    bias:   [llm_dim]
    apply(img_patches[..., vision_dim]) -> [..., llm_dim]
    """
    N, K = weight.shape
    assert bias.shape == (N,)

    # ---- K tiling (contraction axis) ------------------------------------
    Kp_full = _round_up(K, 128)
    if tk is None:
        # Keep the full contraction dim resident unless K is huge (VMEM budget).
        tk = Kp_full if Kp_full <= 2048 else 2048
    n_k = pl.cdiv(K, tk)
    tk_eff = _round_up(pl.cdiv(K, n_k), 128)
    Kp = tk_eff * n_k

    # ---- N tiling (output features; lane-dense, >=2 blocks for v7x when big)
    n_n = pl.cdiv(N, tn)
    tn_eff = _round_up(pl.cdiv(N, n_n), 128)
    Np = tn_eff * n_n

    # ---- Weight / bias prep: hoisted out of the per-call hot path --------
    # Transpose once to [K, N] so the in-kernel contraction is row-major
    # (no per-tile XLU transpose), cast to bf16, zero-pad to tile multiples.
    w_kn = jnp.asarray(weight).T.astype(compute_dtype)           # [K, N]
    if (Kp, Np) != (K, N):
        w_kn = jnp.pad(w_kn, ((0, Kp - K), (0, Np - N)))
    b2d = jnp.asarray(bias).astype(jnp.float32).reshape(1, N)
    if Np != N:
        b2d = jnp.pad(b2d, ((0, 0), (0, Np - N)))

    x_item = jnp.dtype(compute_dtype).itemsize
    w_item = jnp.dtype(compute_dtype).itemsize

    def apply(img_patches: jax.Array) -> jax.Array:
        *lead, Kx = img_patches.shape
        assert Kx == K, f"expected last dim {K}, got {Kx}"
        odt = out_dtype if out_dtype is not None else img_patches.dtype

        M = 1
        for d in lead:
            M *= d

        # ---- M tiling (rows): clamp + minimize padding -------------------
        n_m = pl.cdiv(M, tm)
        tm_eff = _round_up(pl.cdiv(M, n_m), 8)
        Mp = tm_eff * n_m

        x2d = img_patches.reshape(M, K).astype(compute_dtype)
        if (Mp, Kp) != (M, K):
            x2d = jnp.pad(x2d, ((0, Mp - M), (0, Kp - K)))

        o_item = jnp.dtype(odt).itemsize
        cost = pl.CostEstimate(
            flops=2 * Mp * Np * Kp,
            transcendentals=0,
            bytes_accessed=(
                Mp * Kp * x_item * n_n      # x re-read once per N block
                + Kp * Np * w_item * n_m    # weight re-read once per M block
                + Mp * Np * o_item          # output written once
                + Np * 4 * n_m              # bias (negligible)
            ),
        )
        cparams = pltpu.CompilerParams(
            dimension_semantics=("parallel", "parallel") + (("arbitrary",) if n_k > 1 else ()),
            vmem_limit_bytes=vmem_limit_bytes,
        )

        if n_k == 1:
            # 2-D grid: single K step, no accumulator scratch, direct store.
            grid_spec = pltpu.PrefetchScalarGridSpec(
                num_scalar_prefetch=0,
                grid=(n_m, n_n),
                in_specs=[
                    pl.BlockSpec((tm_eff, Kp), lambda i, j: (i, 0)),     # x  [M, K]
                    pl.BlockSpec((Kp, tn_eff), lambda i, j: (0, j)),     # w  [K, N]
                    pl.BlockSpec((1, tn_eff), lambda i, j: (0, j)),      # bias
                ],
                out_specs=pl.BlockSpec((tm_eff, tn_eff), lambda i, j: (i, j)),
            )
            kernel = _linear_kernel_2d
        else:
            # 3-D fallback for very large K: f32 accumulator + init/finalize.
            grid_spec = pltpu.PrefetchScalarGridSpec(
                num_scalar_prefetch=0,
                grid=(n_m, n_n, n_k),
                in_specs=[
                    pl.BlockSpec((tm_eff, tk_eff), lambda i, j, k: (i, k)),  # x  [M, K]
                    pl.BlockSpec((tk_eff, tn_eff), lambda i, j, k: (k, j)),  # w  [K, N]
                    pl.BlockSpec((1, tn_eff), lambda i, j, k: (0, j)),       # bias
                ],
                out_specs=pl.BlockSpec((tm_eff, tn_eff), lambda i, j, k: (i, j)),
                scratch_shapes=[pltpu.VMEM((tm_eff, tn_eff), jnp.float32)],
            )
            kernel = _linear_kernel_3d

        out2d = pl.pallas_call(
            kernel,
            out_shape=jax.ShapeDtypeStruct((Mp, Np), odt),
            grid_spec=grid_spec,
            compiler_params=cparams,
            cost_estimate=cost,
        )(x2d, w_kn, b2d)

        if (Mp, Np) != (M, N):
            out2d = out2d[:M, :N]
        return out2d.reshape(*lead, N)

    return apply


def linear_projector(img_patches: jax.Array, weight: jax.Array, bias: jax.Array, **kw) -> jax.Array:
    """Convenience one-shot API. For repeated calls, build the closure once with
    make_linear_projector(weight, bias) so the weight prep (transpose/cast/pad)
    stays out of the hot path."""
    return make_linear_projector(weight, bias, **kw)(img_patches)


if __name__ == "__main__":
    # Small shapes consistent with the module: batch=2, num_patches=8,
    # vision_dim=32, llm_dim=64.
    B, S, vision_dim, llm_dim = 2, 8, 32, 64

    key = jax.random.PRNGKey(0)
    kx, kw, kb = jax.random.split(key, 3)

    # Deterministic parameter init (mimics nn.Linear's uniform(-1/sqrt(fan_in), +)).
    bound = 1.0 / math.sqrt(vision_dim)
    weight = jax.random.uniform(kw, (llm_dim, vision_dim), jnp.float32, -bound, bound)
    bias = jax.random.uniform(kb, (llm_dim,), jnp.float32, -bound, bound)

    img_patches = jax.random.normal(kx, (B, S, vision_dim), jnp.float32)

    projector = make_linear_projector(weight, bias)   # weight prep hoisted / cached
    out = projector(img_patches)
    jax.block_until_ready(out)

    # Sanity check against plain JAX f32 reference (bf16 matmul inputs -> loose tol).
    ref = img_patches @ weight.T + bias
    assert out.shape == (B, S, llm_dim)
    assert jnp.allclose(out, ref, atol=3e-2, rtol=3e-2), float(jnp.max(jnp.abs(out - ref)))

    print("KERNEL_OK")
</pallas_src>

<mosaic_0001>
module attributes {stable_mosaic.version = 11 : i64} {
  func.func @_linear_kernel_2d(%arg0: i32, %arg1: i32, %arg2: memref<16x128xbf16, #tpu.memory_space<vmem>>, %arg3: memref<128x128xbf16, #tpu.memory_space<vmem>>, %arg4: memref<1x128xf32, #tpu.memory_space<vmem>>, %arg5: memref<16x128xf32, #tpu.memory_space<vmem>>) attributes {dimension_semantics = [#tpu.dimension_semantics<parallel>, #tpu.dimension_semantics<parallel>], iteration_bounds = array<i64: 1, 1>, scalar_prefetch = 0 : i64, scratch_operands = 0 : i64, tpu.core_type = #tpu.core_type<tc>, window_params = [{transform_indices = @transform_0, window_bounds = array<i64: 16, 128>}, {transform_indices = @transform_1, window_bounds = array<i64: 128, 128>}, {transform_indices = @transform_2, window_bounds = array<i64: 1, 128>}, {transform_indices = @transform_3, window_bounds = array<i64: 16, 128>}]} {
    %c0 = arith.constant 0 : index
    %c0_0 = arith.constant 0 : index
    %0 = vector.load %arg2[%c0, %c0_0] : memref<16x128xbf16, #tpu.memory_space<vmem>>, vector<16x128xbf16>
    %c0_1 = arith.constant 0 : index
    %c0_2 = arith.constant 0 : index
    %1 = vector.load %arg3[%c0_1, %c0_2] : memref<128x128xbf16, #tpu.memory_space<vmem>>, vector<128x128xbf16>
    %cst = arith.constant dense<0.000000e+00> : vector<16x128xf32>
    %2 = tpu.matmul %0, %1, %cst {dimension_numbers = #tpu.dot_dimension_numbers<[1], [0], [0], [1], [0, 0, 1, 1], [], []>} : vector<16x128xbf16>, vector<128x128xbf16>, vector<16x128xf32> -> vector<16x128xf32>
    %c0_3 = arith.constant 0 : index
    %c0_4 = arith.constant 0 : index
    %3 = vector.load %arg4[%c0_3, %c0_4] : memref<1x128xf32, #tpu.memory_space<vmem>>, vector<1x128xf32>
    %4 = vector.broadcast %3 : vector<1x128xf32> to vector<16x128xf32>
    %5 = arith.addf %2, %4 : vector<16x128xf32>
    %c0_5 = arith.constant 0 : index
    %c0_6 = arith.constant 0 : index
    %6 = vector.load %arg5[%c0_5, %c0_6] : memref<16x128xf32, #tpu.memory_space<vmem>>, vector<16x128xf32>
    tpu.vector_store %arg5[%c0_5, %c0_6], %5 {strides = array<i32>} : memref<16x128xf32, #tpu.memory_space<vmem>>, vector<16x128xf32>,
    return
  }
  func.func @transform_0(%arg0: i32, %arg1: i32) -> (i32, i32) {
    %c0_i32 = arith.constant 0 : i32
    %c0_i32_0 = arith.constant 0 : i32
    return %arg0, %c0_i32 : i32, i32
  }
  func.func @transform_1(%arg0: i32, %arg1: i32) -> (i32, i32) {
    %c0_i32 = arith.constant 0 : i32
    %c0_i32_0 = arith.constant 0 : i32
    return %c0_i32, %arg1 : i32, i32
  }
  func.func @transform_2(%arg0: i32, %arg1: i32) -> (i32, i32) {
    %c0_i32 = arith.constant 0 : i32
    %c0_i32_0 = arith.constant 0 : i32
    return %c0_i32, %arg1 : i32, i32
  }
  func.func @transform_3(%arg0: i32, %arg1: i32) -> (i32, i32) {
    %c0_i32 = arith.constant 0 : i32
    return %arg0, %arg1 : i32, i32
  }
}

</mosaic_0001>

<bundles_post_ra>
// kernel: tpu_custom_call.1
= control target key start
LH: loop header
LB: loop body
LE: loop exit
PB: predicated region body
PF: predicated region fallthrough
CT: control target
= control target key end

     0   :  { %8 = vsyncpa [#allocation3], 0  ;;  %s329_s0 = inlined_call_operand.hbm [shape: bf16[16,128], index: 0, kind: input, shape index: {}]   ;;  %s330_s1 = inlined_call_operand.hbm [shape: bf16[128,128], index: 1, kind: input, shape index: {}]   ;;  %s331_s2 = inlined_call_operand.vmem [shape: f32[1,128], index: 2, kind: input, shape index: {}]   ;;  %s332_s3 = inlined_call_operand.hbm [shape: f32[16,128], index: 3, kind: output, shape index: {}]  }
   0x1   :  { %9 = vsyncpa [#allocation6], 0 }
   0x2   :  { %10 = vsyncpa [#allocation4], 0  ;;  %s15_s14 = sshll.u32 %s329_s0, 4  ;;  %s290_s15 = smov [#allocation2]   ;;  %s16_s14 = int_to_ptr.hbm [resolvable:$true] %s15_s14 }
   0x3   :  { %s17_s16 = sshll.u32 %s290_s15, 4  ;;  %s28_s19 = sshll.u32 %s330_s1, 4  ;;  %s18_s16 = int_to_ptr.vmem [resolvable:$true] %s17_s16  ;;  %s29_s19 = int_to_ptr.hbm [resolvable:$true] %s28_s19 }
   0x4   :  { %s291_s20 = smov 64   ;;  %s292_s21 = smov 4  }
   0x5   :  { %23 = dma.hbm_to_vmem [thread:$0]  %s16_s14, 128, %s18_s16, [#allocation3], %s291_s20, %s291_s20, %s292_s21  }
   0x6   :  { %s293_s22 = smov [#allocation5]  }
   0x7   :  { %s30_s23 = sshll.u32 %s293_s22, 4  ;;  %s31_s23 = int_to_ptr.vmem [resolvable:$true] %s30_s23 }
   0x8   :  { %36 = dma.hbm_to_vmem [thread:$0]  %s29_s19, 1024, %s31_s23, [#allocation6], %s291_s20, %s291_s20, %s292_s21  }
   0x9   :  { %284 = dma.done.wait [#allocation3], 128  }
   0xa   :  { %285 = vsyncadd [#allocation3], 4294967168 }
   0xb   :  { %286 = dma.done.wait [#allocation6], 1024  }
   0xc   :  { %287 = vsyncadd [#allocation6], 4294966272  ;;  %v203_v0 = vld [vmem:[#allocation5 + $0x38] sm:$0xff]  ;;  %v202_v1 = vld [vmem:[#allocation5 + $0x30] sm:$0xff]  ;;  %s294_s24 = smov [#allocation7]   ;;  %s145_s28 = sshll.u32 %s332_s3, 4  ;;  %s146_s28 = int_to_ptr.hbm [resolvable:$true] %s145_s28 }
   0xd   :  { %123 = vmatpush.bf16.msra.mxu0 %v203_v0  ;;  %v201_v2 = vld [vmem:[#allocation5 + $0x28] sm:$0xff]  ;;  %v200_v3 = vld [vmem:[#allocation5 + $0x20] sm:$0xff]  ;;  %v199_v4 = vld [vmem:[#allocation5 + $0x18] sm:$0xff]  ;;  %s143_s25 = sshll.u32 %s294_s24, 4  ;;  %s295_s29 = smov 128   ;;  %s144_s25 = int_to_ptr.vmem [resolvable:$true] %s143_s25 }
   0xe   :  { %v198_v5 = vld [vmem:[#allocation5 + $0x10] sm:$0xff]  ;;  %v197_v6 = vld [vmem:[#allocation5 + $0x8] sm:$0xff]  ;;  %v196_v7 = vld [vmem:[#allocation5] sm:$0xff]  ;;  %s296_s30 = smov 8  }
   0xf   :  { %v195_v8 = vld [vmem:[#allocation2] sm:$0xff] }
  0x10   :  { %v211_v9 = vld [vmem:[%s331_s2] ss:$0 sm:$0xff] }
  0x11   :  { %124 = vmatpush.bf16.msra.mxu0 %v202_v1 }
  0x15   :  { %125 = vmatpush.bf16.msra.mxu0 %v201_v2 }
  0x19   :  { %126 = vmatpush.bf16.msra.mxu0 %v200_v3 }
  0x1d   :  { %127 = vmatpush.bf16.msra.mxu0 %v199_v4 }
  0x21   :  { %128 = vmatpush.bf16.msra.mxu0 %v198_v5 }
  0x25   :  { %129 = vmatpush.bf16.msra.mxu0 %v197_v6 }
  0x29   :  { %130 = vmatpush.bf16.msra.mxu0 %v196_v7 }
  0x2c   :  { %131 = vmatmul.bf16.vlgmr.msra.gmra.mxu0 %v195_v8 }
  0xa9   :  { %v132_v10 = vpop.f32.mrf.mxu0 }
  0xaa   :  { %v133_v11 = vadd.f32 %v211_v9, %v132_v10 }
  0xac   :  { %137 = vst [vmem:[#allocation7] sm:$0xff] %v133_v11 }
  0xb1   :  { %v134_v12 = vpop.f32.mrf.mxu0 }
  0xb2   :  { %v135_v13 = vadd.f32 %v211_v9, %v134_v12 }
  0xb4   :  { %138 = vst [vmem:[#allocation7 + $0x8] sm:$0xff] %v135_v13 }
  0xb5   :  { %151 = dma.vmem_to_hbm [thread:$0]  %s144_s25, 256, %s146_s28, [#allocation4], %s295_s29, %s295_s29, %s296_s30  }
  0xb6   :  { %288 = dma.done.wait [#allocation4], 256  }
  0xb7   :  { %289 = vsyncadd [#allocation4], 4294967040 }
  0xb8   :  { %156 = vsyncpa [#allocation3], 1 }
  0xb9   :  { %157 = vsyncpa [#allocation6], 1 }
  0xba   :  { %158 = vsyncpa [#allocation4], 1 }

</bundles_post_ra>
